<compile_context>
chip_gen: v5e
topology: v5e:2x2
jax: 0.10.0
libtpu: 0.0.40
codegen_flags: <defaults>
</compile_context>

<pallas_src>
import functools

import jax
import jax.numpy as jnp
from jax.experimental import pallas as pl
from jax.experimental.pallas import tpu as pltpu


def _round_up(x: int, m: int) -> int:
    return ((x + m - 1) // m) * m


def classifier_kernel(idx_ref, table_ref, out_ref):
    # idx_ref   : (TM, 1)        int32   token/op ids for this row tile
    # table_ref : (n_ops, n_ops) float32 fused table emb @ W^T + b (VMEM resident)
    # out_ref   : (TM, n_ops)    float32 logits tile (lane dim == full n_ops)
    idx = idx_ref[...]                                   # (TM, 1)
    tm = idx.shape[0]
    k = table_ref.shape[0]
    # Exact row gather of the fused table via a 0/1 one-hot matmul on the MXU.
    onehot = (idx == jax.lax.broadcasted_iota(jnp.int32, (tm, k), 1)
              ).astype(jnp.float32)                      # (TM, n_ops)
    out_ref[...] = jnp.dot(onehot, table_ref[...],
                           preferred_element_type=jnp.float32)


@functools.partial(jax.jit, static_argnames=("tile_m",))
def classifier_forward(x, emb_table, fc_weight, fc_bias, tile_m=2048):
    """x: (B, S) integer ids. Returns (B, S, n_ops) float32 logits."""
    B, S = x.shape
    N = B * S
    n_ops, emb_dim = emb_table.shape

    # Weight-space fusion (tiny, N-independent):
    #   logits[i] = emb[x[i]] @ W^T + b == (emb @ W^T + b)[x[i]]
    fused = (jnp.dot(emb_table.astype(jnp.float32),
                     fc_weight.astype(jnp.float32).T,
                     precision=jax.lax.Precision.HIGHEST,
                     preferred_element_type=jnp.float32)
             + fc_bias.astype(jnp.float32)[None, :])     # (n_ops, n_ops)
    # NOTE: the fused table is O(n_ops^2) and must fit in VMEM; for very large
    # vocabularies (> ~2K classes on v7x's 64 MiB VMEM) tile the class dim or
    # fall back to the unfused gather-then-matmul path.

    idx = x.reshape(N, 1).astype(jnp.int32)

    # Row tile: large enough to amortize the ~0.35us/step pipeline overhead,
    # small enough to keep >= ~8 grid steps so the "parallel" token axis can
    # shard across both v7x TensorCores. Always a multiple of 8 sublanes.
    tm = min(tile_m, max(256, _round_up(pl.cdiv(N, 8), 256)))
    grid_m = pl.cdiv(N, tm)                              # ragged last block OK

    # Explicit VMEM budget: resident table + double-buffered idx/out tiles
    # (both lane-padded to 128 in VMEM layout).
    lane = 128
    table_bytes = _round_up(n_ops, 8) * _round_up(n_ops, lane) * 4
    tile_bytes = 2 * tm * (lane + _round_up(n_ops, lane)) * 4
    vmem_limit = min(32 * 1024 * 1024,
                     max(16 * 1024 * 1024, 2 * (table_bytes + tile_bytes)))

    cost = pl.CostEstimate(
        flops=2 * N * n_ops * n_ops,
        transcendentals=0,
        bytes_accessed=N * 4 + n_ops * n_ops * 4 + N * n_ops * 4)

    out = pl.pallas_call(
        classifier_kernel,
        out_shape=jax.ShapeDtypeStruct((N, n_ops), jnp.float32),
        grid_spec=pltpu.PrefetchScalarGridSpec(
            num_scalar_prefetch=0,
            grid=(grid_m,),
            in_specs=[
                # Token-id tile, pipelined over the row grid.
                pl.BlockSpec((tm, 1), lambda i: (i, 0)),
                # Fused table: whole array resident in VMEM, single-buffered.
                pl.BlockSpec(memory_space=pltpu.MemorySpace.VMEM),
            ],
            # Lane dim == full n_ops (equals the array dim, so allowed):
            # no 128-padding of the output and no post-kernel slice.
            out_specs=pl.BlockSpec((tm, n_ops), lambda i: (i, 0)),
        ),
        compiler_params=pltpu.CompilerParams(
            dimension_semantics=("parallel",),   # shard token loop across TCs (v7x)
            vmem_limit_bytes=vmem_limit,
        ),
        cost_estimate=cost,
    )(idx, fused)

    return out.reshape(B, S, n_ops)


def _reference(x, emb_table, fc_weight, fc_bias):
    return jnp.dot(emb_table[x], fc_weight.T,
                   precision=jax.lax.Precision.HIGHEST) + fc_bias


def _make_params(key, n_ops, emb_dim):
    k_emb, k_w, k_b = jax.random.split(key, 3)
    emb_table = jax.random.normal(k_emb, (n_ops, emb_dim), dtype=jnp.float32)
    bound = 1.0 / (emb_dim ** 0.5)
    fc_weight = jax.random.uniform(k_w, (n_ops, emb_dim), dtype=jnp.float32,
                                   minval=-bound, maxval=bound)
    fc_bias = jax.random.uniform(k_b, (n_ops,), dtype=jnp.float32,
                                 minval=-bound, maxval=bound)
    return emb_table, fc_weight, fc_bias


if __name__ == "__main__":
    key = jax.random.PRNGKey(0)
    k_p1, k_x1, k_p2, k_x2 = jax.random.split(key, 4)

    # --- Small config matching the module defaults (n_ops=16, emb_dim=16) ---
    n_ops, emb_dim, B, S = 16, 16, 2, 8
    emb_table, fc_weight, fc_bias = _make_params(k_p1, n_ops, emb_dim)
    x = jax.random.randint(k_x1, (B, S), 0, n_ops, dtype=jnp.int32)

    out = jax.block_until_ready(
        classifier_forward(x, emb_table, fc_weight, fc_bias))
    ref = _reference(x, emb_table, fc_weight, fc_bias)
    assert out.shape == (B, S, n_ops)
    assert jnp.allclose(out, ref, atol=1e-5, rtol=1e-5), "mismatch (small)"

    # --- Larger config: several grid steps + ragged last row block ----------
    n_ops2, emb_dim2, B2, S2 = 40, 32, 4, 100            # N = 400
    emb_table2, fc_weight2, fc_bias2 = _make_params(k_p2, n_ops2, emb_dim2)
    x2 = jax.random.randint(k_x2, (B2, S2), 0, n_ops2, dtype=jnp.int32)

    out2 = jax.block_until_ready(
        classifier_forward(x2, emb_table2, fc_weight2, fc_bias2, tile_m=128))
    ref2 = _reference(x2, emb_table2, fc_weight2, fc_bias2)
    assert out2.shape == (B2, S2, n_ops2)
    assert jnp.allclose(out2, ref2, atol=1e-5, rtol=1e-5), "mismatch (ragged)"

    print("KERNEL_OK")
</pallas_src>

<mosaic_0001>
module attributes {stable_mosaic.version = 11 : i64} {
  func.func @classifier_kernel(%arg0: i32, %arg1: memref<256x1xi32, #tpu.memory_space<vmem>>, %arg2: memref<16x16xf32, #tpu.memory_space<vmem>>, %arg3: memref<256x16xf32, #tpu.memory_space<vmem>>) attributes {dimension_semantics = [#tpu.dimension_semantics<parallel>], iteration_bounds = array<i64: 1>, scalar_prefetch = 0 : i64, scratch_operands = 0 : i64, tpu.core_type = #tpu.core_type<tc>, window_params = [{transform_indices = @transform_0, window_bounds = array<i64: 256, 1>}, {pipeline_mode = #tpu.pipeline_mode<synchronous>, transform_indices = @transform_1, window_bounds = array<i64: 16, 16>}, {transform_indices = @transform_2, window_bounds = array<i64: 256, 16>}]} {
    %c0 = arith.constant 0 : index
    %c0_0 = arith.constant 0 : index
    %0 = vector.load %arg1[%c0, %c0_0] : memref<256x1xi32, #tpu.memory_space<vmem>>, vector<256x1xi32>
    %1 = tpu.iota {dimensions = array<i32: 1>} : vector<256x16xi32>
    %2 = vector.broadcast %0 : vector<256x1xi32> to vector<256x16xi32>
    %3 = arith.cmpi eq, %2, %1 : vector<256x16xi32>
    %4 = arith.extui %3 : vector<256x16xi1> to vector<256x16xi32>
    %5 = arith.sitofp %4 : vector<256x16xi32> to vector<256x16xf32>
    %c0_1 = arith.constant 0 : index
    %c0_2 = arith.constant 0 : index
    %6 = vector.load %arg2[%c0_1, %c0_2] : memref<16x16xf32, #tpu.memory_space<vmem>>, vector<16x16xf32>
    %cst = arith.constant dense<0.000000e+00> : vector<256x16xf32>
    %7 = tpu.matmul %5, %6, %cst {dimension_numbers = #tpu.dot_dimension_numbers<[1], [0], [0], [1], [0, 0, 1, 1], [], []>} : vector<256x16xf32>, vector<16x16xf32>, vector<256x16xf32> -> vector<256x16xf32>
    %c0_3 = arith.constant 0 : index
    %c0_4 = arith.constant 0 : index
    %8 = vector.load %arg3[%c0_3, %c0_4] : memref<256x16xf32, #tpu.memory_space<vmem>>, vector<256x16xf32>
    tpu.vector_store %arg3[%c0_3, %c0_4], %7 {strides = array<i32>} : memref<256x16xf32, #tpu.memory_space<vmem>>, vector<256x16xf32>,
    return
  }
  func.func @transform_0(%arg0: i32) -> (i32, i32) {
    %c0_i32 = arith.constant 0 : i32
    %c0_i32_0 = arith.constant 0 : i32
    return %arg0, %c0_i32 : i32, i32
  }
  func.func @transform_1(%arg0: i32) -> (i32, i32) {
    %c0_i32 = arith.constant 0 : i32
    %c0_i32_0 = arith.constant 0 : i32
    %c0_i32_1 = arith.constant 0 : i32
    return %c0_i32, %c0_i32_0 : i32, i32
  }
  func.func @transform_2(%arg0: i32) -> (i32, i32) {
    %c0_i32 = arith.constant 0 : i32
    %c0_i32_0 = arith.constant 0 : i32
    return %arg0, %c0_i32 : i32, i32
  }
}

</mosaic_0001>

<bundles_post_ra>
// kernel: classifier_forward.1
= control target key start
LH: loop header
LB: loop body
LE: loop exit
PB: predicated region body
PF: predicated region fallthrough
CT: control target
= control target key end

     0   :  { %v604_v3 = vmov 0   ;;  %s859_s0 = inlined_call_operand.vmem [shape: s32[16,1], index: 0, kind: input, shape index: {}]   ;;  %s860_s1 = inlined_call_operand.vmem [shape: f32[16,16], index: 1, kind: input, shape index: {}]   ;;  %s861_s2 = inlined_call_operand.hbm [shape: f32[16,16], index: 2, kind: output, shape index: {}]  }
   0x1   :  { %v29_v0 = vld [vmem:[%s859_s0 + $0x88] sm:$0xff]  ;;  %v28_v1 = vld [vmem:[%s859_s0 + $0x80] sm:$0xff]  ;;  %577 = vset.pattern.permute.xlu2 %v604_v3  ;;  %576 = vset.pattern.permute.xlu1 %v604_v3 }
   0x2   :  { %v12_v2 = vld [vmem:[%s859_s0] sm:$0xff]  ;;  %575 = vset.pattern.permute.xlu0 %v604_v3  ;;  %98 = vperm.xlu2 %577, %v29_v0  }
   0x3   :  { %95 = vperm.xlu0 %575, %v28_v1   ;;  %47 = vperm.xlu1 %576, %v12_v2  }
   0x4   :  { %7 = vsyncpa [#allocation3], 0  ;;  %v37_v4 = vld [vmem:[%s859_s0 + $0xc8] sm:$0xff]  ;;  %v36_v5 = vld [vmem:[%s859_s0 + $0xc0] sm:$0xff]  ;;  %v44_v37 = vlaneseq  ;;  %vm240_vm0 = vcmask 130048   ;;  %v605_v42 = vmov 0.0  }
   0x5   :  { %v20_v6 = vld [vmem:[%s859_s0 + $0x40] sm:$0xff]  ;;  %v30_v7 = vld [vmem:[%s859_s0 + $0x90] sm:$0xff]  ;;  %v13_v8 = vld [vmem:[%s859_s0 + $0x8] sm:$0xff] }
   0x6   :  { %v21_v9 = vld [vmem:[%s859_s0 + $0x48] sm:$0xff]  ;;  %v22_v10 = vld [vmem:[%s859_s0 + $0x50] sm:$0xff]  ;;  %v15_v13 = vld [vmem:[%s859_s0 + $0x18] sm:$0xff]  ;;  %v726_v38 = vand.u32 127, %v44_v37 }
   0x7   :  { %v38_v11 = vld [vmem:[%s859_s0 + $0xd0] sm:$0xff]  ;;  %v31_v14 = vld [vmem:[%s859_s0 + $0x98] sm:$0xff]  ;;  %v40_v16 = vld [vmem:[%s859_s0 + $0xe0] sm:$0xff] }
   0x8   :  { %v14_v12 = vld [vmem:[%s859_s0 + $0x10] sm:$0xff]  ;;  %v39_v15 = vld [vmem:[%s859_s0 + $0xd8] sm:$0xff]  ;;  %v32_v18 = vld [vmem:[%s859_s0 + $0xa0] sm:$0xff] }
   0x9   :  { %v23_v17 = vld [vmem:[%s859_s0 + $0x58] sm:$0xff]  ;;  %v33_v19 = vld [vmem:[%s859_s0 + $0xa8] sm:$0xff]  ;;  %v16_v20 = vld [vmem:[%s859_s0 + $0x20] sm:$0xff] }
   0xa   :  { %122 = vperm.xlu2 %577, %v37_v4   ;;  %v24_v21 = vld [vmem:[%s859_s0 + $0x60] sm:$0xff]  ;;  %v25_v22 = vld [vmem:[%s859_s0 + $0x68] sm:$0xff]  ;;  %v18_v25 = vld [vmem:[%s859_s0 + $0x30] sm:$0xff] }
   0xb   :  { %119 = vperm.xlu0 %575, %v36_v5   ;;  %71 = vperm.xlu1 %576, %v20_v6   ;;  %v41_v23 = vld [vmem:[%s859_s0 + $0xe8] sm:$0xff]  ;;  %v34_v26 = vld [vmem:[%s859_s0 + $0xb0] sm:$0xff]  ;;  %v43_v28 = vld [vmem:[%s859_s0 + $0xf8] sm:$0xff] }
   0xc   :  { %v17_v24 = vld [vmem:[%s859_s0 + $0x28] sm:$0xff]  ;;  %v42_v27 = vld [vmem:[%s859_s0 + $0xf0] sm:$0xff]  ;;  %v35_v30 = vld [vmem:[%s859_s0 + $0xb8] sm:$0xff] }
   0xd   :  { %v26_v29 = vld [vmem:[%s859_s0 + $0x70] sm:$0xff]  ;;  %v239_v31 = vld [vmem:[%s860_s1 + $0x8] sm:$0xff]  ;;  %v19_v32 = vld [vmem:[%s859_s0 + $0x38] sm:$0xff] }
   0xe   :  { %351 = vmatpush.msra.mxu0 %v239_v31  ;;  %565 = vmatpush.msra.mxu2 %v239_v31  ;;  %v27_v33 = vld [vmem:[%s859_s0 + $0x78] sm:$0xff]  ;;  %v238_v34 = vld [vmem:[%s860_s1] sm:$0xff] }
   0xf   :  { %564 = vmatpush.msra.mxu1 %v239_v31  ;;  %566 = vmatpush.msra.mxu3 %v239_v31 }
  0x10   :  { %352 = vmatpush.msra.mxu0 %v238_v34  ;;  %568 = vmatpush.msra.mxu2 %v238_v34 }
  0x11   :  { %567 = vmatpush.msra.mxu1 %v238_v34  ;;  %569 = vmatpush.msra.mxu3 %v238_v34 }
  0x12   :  { %101 = vperm.xlu2 %577, %v30_v7  }
  0x13   :  { %50 = vperm.xlu0 %575, %v13_v8   ;;  %74 = vperm.xlu1 %576, %v21_v9  }
  0x1a   :  { %77 = vperm.xlu2 %577, %v22_v10  }
  0x1b   :  { %125 = vperm.xlu0 %575, %v38_v11   ;;  %53 = vperm.xlu1 %576, %v14_v12  }
  0x22   :  { %56 = vperm.xlu2 %577, %v15_v13  }
  0x23   :  { %104 = vperm.xlu0 %575, %v31_v14   ;;  %128 = vperm.xlu1 %576, %v39_v15  }
  0x2a   :  { %131 = vperm.xlu2 %577, %v40_v16  }
  0x2b   :  { %80 = vperm.xlu0 %575, %v23_v17   ;;  %107 = vperm.xlu1 %576, %v32_v18  }
  0x32   :  { %110 = vperm.xlu2 %577, %v33_v19  }
  0x33   :  { %59 = vperm.xlu0 %575, %v16_v20   ;;  %83 = vperm.xlu1 %576, %v24_v21  }
  0x3a   :  { %86 = vperm.xlu2 %577, %v25_v22  }
  0x3b   :  { %134 = vperm.xlu0 %575, %v41_v23   ;;  %62 = vperm.xlu1 %576, %v17_v24  }
  0x42   :  { %65 = vperm.xlu2 %577, %v18_v25  }
  0x43   :  { %113 = vperm.xlu0 %575, %v34_v26   ;;  %137 = vperm.xlu1 %576, %v42_v27  }
  0x4a   :  { %140 = vperm.xlu2 %577, %v43_v28  }
  0x4b   :  { %89 = vperm.xlu0 %575, %v26_v29   ;;  %116 = vperm.xlu1 %576, %v35_v30  }
  0x53   :  { %68 = vperm.xlu0 %575, %v19_v32   ;;  %92 = vperm.xlu1 %576, %v27_v33  }
  0x5c   :  { %v99_v35 = vpop.permute.xlu2 %98 }
  0x5d   :  { %vm159_vm3 = vcmp.eq.s32.totalorder %v99_v35, %v726_v38 }
  0x5e   :  { %v517_v48 = vsel %vm159_vm3, 1.0, %v605_v42 }
  0x64   :  { %v123_v36 = vpop.permute.xlu2 %122 }
  0x65   :  { %vm167_vm6 = vcmp.eq.s32.totalorder %v123_v36, %v726_v38 }
  0x66   :  { %v525_v55 = vsel %vm167_vm6, 1.0, %v605_v42 }
  0x6c   :  { %v102_v39 = vpop.permute.xlu2 %101 }
  0x6d   :  { %vm160_vm7 = vcmp.eq.s32.totalorder %v102_v39, %v726_v38 }
  0x6e   :  { %v518_v56 = vsel %vm160_vm7, 1.0, %v605_v42 }
  0x74   :  { %v78_v47 = vpop.permute.xlu2 %77 }
  0x75   :  { %v96_v40 = vpop.permute.xlu0 %95  ;;  %v48_v41 = vpop.permute.xlu1 %47  ;;  %vm152_vm10 = vcmp.eq.s32.totalorder %v78_v47, %v726_v38 }
  0x76   :  { %vm158_vm1 = vcmp.eq.s32.totalorder %v96_v40, %v726_v38  ;;  %vm142_vm2 = vcmp.eq.s32.totalorder %v48_v41, %v726_v38  ;;  %v510_v60 = vsel %vm152_vm10, 1.0, %v605_v42 }
  0x77   :  { %v516_v43 = vsel %vm158_vm1, 1.0, %v605_v42  ;;  %v500_v44 = vsel %vm142_vm2, 1.0, %v605_v42 }
  0x78   :  { %532 = vmatmul.msk.f32.vlgmr.msra.gmra.mxu0 %vm240_vm0, %v500_v44  ;;  %548 = vmatmul.msk.f32.vlgmr.msra.gmra.mxu2 %vm240_vm0, %v516_v43 }
  0x7c   :  { %v57_v57 = vpop.permute.xlu2 %56 }
  0x7d   :  { %v120_v45 = vpop.permute.xlu0 %119  ;;  %v72_v46 = vpop.permute.xlu1 %71  ;;  %vm145_vm13 = vcmp.eq.s32.totalorder %v57_v57, %v726_v38 }
  0x7e   :  { %vm166_vm4 = vcmp.eq.s32.totalorder %v120_v45, %v726_v38  ;;  %vm150_vm5 = vcmp.eq.s32.totalorder %v72_v46, %v726_v38  ;;  %v503_v2 = vsel %vm145_vm13, 1.0, %v605_v42 }
  0x7f   :  { %v524_v49 = vsel %vm166_vm4, 1.0, %v605_v42  ;;  %v508_v50 = vsel %vm150_vm5, 1.0, %v605_v42 }
  0x80   :  { %540 = vmatmul.msk.f32.vlgmr.msra.gmra.mxu1 %vm240_vm0, %v508_v50  ;;  %549 = vmatmul.msk.f32.gmra.mxu2 %vm240_vm0, %v517_v48 }
  0x81   :  { %556 = vmatmul.msk.f32.vlgmr.msra.gmra.mxu3 %vm240_vm0, %v524_v49 }
  0x84   :  { %v132_v63 = vpop.permute.xlu2 %131 }
  0x85   :  { %v51_v51 = vpop.permute.xlu0 %50  ;;  %v75_v52 = vpop.permute.xlu1 %74  ;;  %vm170_vm1 = vcmp.eq.s32.totalorder %v132_v63, %v726_v38 }
  0x86   :  { %vm143_vm8 = vcmp.eq.s32.totalorder %v51_v51, %v726_v38  ;;  %vm151_vm9 = vcmp.eq.s32.totalorder %v75_v52, %v726_v38  ;;  %v528_v10 = vsel %vm170_vm1, 1.0, %v605_v42 }
  0x87   :  { %v501_v53 = vsel %vm143_vm8, 1.0, %v605_v42  ;;  %v509_v54 = vsel %vm151_vm9, 1.0, %v605_v42 }
  0x88   :  { %533 = vmatmul.msk.f32.gmra.mxu0 %vm240_vm0, %v501_v53  ;;  %541 = vmatmul.msk.f32.gmra.mxu1 %vm240_vm0, %v509_v54 }
  0x89   :  { %550 = vmatmul.msk.f32.gmra.mxu2 %vm240_vm0, %v518_v56  ;;  %557 = vmatmul.msk.f32.gmra.mxu3 %vm240_vm0, %v525_v55 }
  0x8c   :  { %v111_v5 = vpop.permute.xlu2 %110 }
  0x8d   :  { %v126_v58 = vpop.permute.xlu0 %125  ;;  %v54_v59 = vpop.permute.xlu1 %53  ;;  %vm163_vm4 = vcmp.eq.s32.totalorder %v111_v5, %v726_v38 }
  0x8e   :  { %vm168_vm11 = vcmp.eq.s32.totalorder %v126_v58, %v726_v38  ;;  %vm144_vm12 = vcmp.eq.s32.totalorder %v54_v59, %v726_v38  ;;  %v521_v16 = vsel %vm163_vm4, 1.0, %v605_v42 }
  0x8f   :  { %v526_v61 = vsel %vm168_vm11, 1.0, %v605_v42  ;;  %v502_v62 = vsel %vm144_vm12, 1.0, %v605_v42 }
  0x90   :  { %534 = vmatmul.msk.f32.gmra.mxu0 %vm240_vm0, %v502_v62  ;;  %542 = vmatmul.msk.f32.gmra.mxu1 %vm240_vm0, %v510_v60 }
  0x91   :  { %558 = vmatmul.msk.f32.gmra.mxu3 %vm240_vm0, %v526_v61 }
  0x94   :  { %v87_v13 = vpop.permute.xlu2 %86 }
  0x95   :  { %v105_v0 = vpop.permute.xlu0 %104  ;;  %v129_v1 = vpop.permute.xlu1 %128  ;;  %vm155_vm7 = vcmp.eq.s32.totalorder %v87_v13, %v726_v38 }
  0x96   :  { %vm161_vm14 = vcmp.eq.s32.totalorder %v105_v0, %v726_v38  ;;  %vm169_vm15 = vcmp.eq.s32.totalorder %v129_v1, %v726_v38  ;;  %v513_v19 = vsel %vm155_vm7, 1.0, %v605_v42 }
  0x97   :  { %v519_v3 = vsel %vm161_vm14, 1.0, %v605_v42  ;;  %v527_v4 = vsel %vm169_vm15, 1.0, %v605_v42 }
  0x98   :  { %535 = vmatmul.msk.f32.gmra.mxu0 %vm240_vm0, %v503_v2  ;;  %551 = vmatmul.msk.f32.gmra.mxu2 %vm240_vm0, %v519_v3 }
  0x99   :  { %559 = vmatmul.msk.f32.gmra.mxu3 %vm240_vm0, %v527_v4 }
  0x9c   :  { %v66_v22 = vpop.permute.xlu2 %65 }
  0x9d   :  { %v81_v6 = vpop.permute.xlu0 %80  ;;  %v108_v7 = vpop.permute.xlu1 %107  ;;  %vm148_vm10 = vcmp.eq.s32.totalorder %v66_v22, %v726_v38 }
  0x9e   :  { %vm153_vm2 = vcmp.eq.s32.totalorder %v81_v6, %v726_v38  ;;  %vm162_vm3 = vcmp.eq.s32.totalorder %v108_v7, %v726_v38  ;;  %v506_v25 = vsel %vm148_vm10, 1.0, %v605_v42 }
  0x9f   :  { %v511_v8 = vsel %vm153_vm2, 1.0, %v605_v42  ;;  %v520_v9 = vsel %vm162_vm3, 1.0, %v605_v42 }
  0xa0   :  { %543 = vmatmul.msk.f32.gmra.mxu1 %vm240_vm0, %v511_v8  ;;  %552 = vmatmul.msk.f32.gmra.mxu2 %vm240_vm0, %v520_v9 }
  0xa1   :  { %560 = vmatmul.msk.f32.gmra.mxu3 %vm240_vm0, %v528_v10 }
  0xa4   :  { %v141_v28 = vpop.permute.xlu2 %140 }
  0xa5   :  { %v60_v11 = vpop.permute.xlu0 %59  ;;  %v84_v12 = vpop.permute.xlu1 %83  ;;  %vm173_vm13 = vcmp.eq.s32.totalorder %v141_v28, %v726_v38 }
  0xa6   :  { %vm146_vm5 = vcmp.eq.s32.totalorder %v60_v11, %v726_v38  ;;  %vm154_vm6 = vcmp.eq.s32.totalorder %v84_v12, %v726_v38  ;;  %v531_v33 = vsel %vm173_vm13, 1.0, %v605_v42 }
  0xa7   :  { %v504_v14 = vsel %vm146_vm5, 1.0, %v605_v42  ;;  %v512_v15 = vsel %vm154_vm6, 1.0, %v605_v42 }
  0xa8   :  { %536 = vmatmul.msk.f32.gmra.mxu0 %vm240_vm0, %v504_v14  ;;  %544 = vmatmul.msk.f32.gmra.mxu1 %vm240_vm0, %v512_v15 }
  0xa9   :  { %553 = vmatmul.msk.f32.gmra.mxu2 %vm240_vm0, %v521_v16 }
  0xad   :  { %v135_v17 = vpop.permute.xlu0 %134  ;;  %v63_v18 = vpop.permute.xlu1 %62 }
  0xae   :  { %vm171_vm8 = vcmp.eq.s32.totalorder %v135_v17, %v726_v38  ;;  %vm147_vm9 = vcmp.eq.s32.totalorder %v63_v18, %v726_v38 }
  0xaf   :  { %v529_v20 = vsel %vm171_vm8, 1.0, %v605_v42  ;;  %v505_v21 = vsel %vm147_vm9, 1.0, %v605_v42 }
  0xb0   :  { %537 = vmatmul.msk.f32.gmra.mxu0 %vm240_vm0, %v505_v21  ;;  %545 = vmatmul.msk.f32.gmra.mxu1 %vm240_vm0, %v513_v19 }
  0xb1   :  { %561 = vmatmul.msk.f32.gmra.mxu3 %vm240_vm0, %v529_v20 }
  0xb5   :  { %v114_v23 = vpop.permute.xlu0 %113  ;;  %v138_v24 = vpop.permute.xlu1 %137 }
  0xb6   :  { %vm164_vm11 = vcmp.eq.s32.totalorder %v114_v23, %v726_v38  ;;  %vm172_vm12 = vcmp.eq.s32.totalorder %v138_v24, %v726_v38 }
  0xb7   :  { %v522_v26 = vsel %vm164_vm11, 1.0, %v605_v42  ;;  %v530_v27 = vsel %vm172_vm12, 1.0, %v605_v42 }
  0xb8   :  { %538 = vmatmul.msk.f32.gmra.mxu0 %vm240_vm0, %v506_v25  ;;  %554 = vmatmul.msk.f32.gmra.mxu2 %vm240_vm0, %v522_v26 }
  0xb9   :  { %562 = vmatmul.msk.f32.gmra.mxu3 %vm240_vm0, %v530_v27 }
  0xbd   :  { %v90_v29 = vpop.permute.xlu0 %89  ;;  %v117_v30 = vpop.permute.xlu1 %116 }
  0xbe   :  { %vm156_vm14 = vcmp.eq.s32.totalorder %v90_v29, %v726_v38  ;;  %vm165_vm15 = vcmp.eq.s32.totalorder %v117_v30, %v726_v38 }
  0xbf   :  { %v514_v31 = vsel %vm156_vm14, 1.0, %v605_v42  ;;  %v523_v32 = vsel %vm165_vm15, 1.0, %v605_v42 }
  0xc0   :  { %546 = vmatmul.msk.f32.gmra.mxu1 %vm240_vm0, %v514_v31  ;;  %555 = vmatmul.msk.f32.gmra.mxu2 %vm240_vm0, %v523_v32 }
  0xc1   :  { %563 = vmatmul.msk.f32.gmra.mxu3 %vm240_vm0, %v531_v33 }
  0xc5   :  { %v69_v34 = vpop.permute.xlu0 %68  ;;  %v93_v35 = vpop.permute.xlu1 %92 }
  0xc6   :  { %vm149_vm1 = vcmp.eq.s32.totalorder %v69_v34, %v726_v38  ;;  %vm157_vm2 = vcmp.eq.s32.totalorder %v93_v35, %v726_v38 }
  0xc7   :  { %v507_v36 = vsel %vm149_vm1, 1.0, %v605_v42  ;;  %v515_v37 = vsel %vm157_vm2, 1.0, %v605_v42 }
  0xc8   :  { %539 = vmatmul.msk.f32.gmra.mxu0 %vm240_vm0, %v507_v36  ;;  %547 = vmatmul.msk.f32.gmra.mxu1 %vm240_vm0, %v515_v37 }
  0xf5   :  { %v354_v39 = vpop.f32.mrf.mxu0 }
  0xf6   :  { %450 = vst.msk [vmem:[#allocation2] sm:$0xff] %vm240_vm0, %v354_v39 }
  0xfb   :  { %v402_v40 = vpop.f32.mrf.mxu2 }
  0xfc   :  { %466 = vst.msk [vmem:[#allocation2 + $0x80] sm:$0xff] %vm240_vm0, %v402_v40 }
  0xfd   :  { %v378_v41 = vpop.f32.mrf.mxu1 }
  0xfe   :  { %458 = vst.msk [vmem:[#allocation2 + $0x40] sm:$0xff] %vm240_vm0, %v378_v41 }
 0x103   :  { %v405_v43 = vpop.f32.mrf.mxu2 }
 0x104   :  { %467 = vst.msk [vmem:[#allocation2 + $0x88] sm:$0xff] %vm240_vm0, %v405_v43  ;;  %v426_v38 = vpop.f32.mrf.mxu3 }
 0x105   :  { %474 = vst.msk [vmem:[#allocation2 + $0xc0] sm:$0xff] %vm240_vm0, %v426_v38  ;;  %v357_v42 = vpop.f32.mrf.mxu0  ;;  %v381_v44 = vpop.f32.mrf.mxu1 }
 0x106   :  { %451 = vst.msk [vmem:[#allocation2 + $0x8] sm:$0xff] %vm240_vm0, %v357_v42 }
 0x107   :  { %459 = vst.msk [vmem:[#allocation2 + $0x48] sm:$0xff] %vm240_vm0, %v381_v44 }
 0x10c   :  { %v408_v45 = vpop.f32.mrf.mxu2  ;;  %v429_v46 = vpop.f32.mrf.mxu3 }
 0x10d   :  { %468 = vst.msk [vmem:[#allocation2 + $0x90] sm:$0xff] %vm240_vm0, %v408_v45  ;;  %v360_v47 = vpop.f32.mrf.mxu0  ;;  %v384_v48 = vpop.f32.mrf.mxu1 }
 0x10e   :  { %475 = vst.msk [vmem:[#allocation2 + $0xc8] sm:$0xff] %vm240_vm0, %v429_v46 }
 0x10f   :  { %452 = vst.msk [vmem:[#allocation2 + $0x10] sm:$0xff] %vm240_vm0, %v360_v47 }
 0x110   :  { %460 = vst.msk [vmem:[#allocation2 + $0x50] sm:$0xff] %vm240_vm0, %v384_v48 }
 0x114   :  { %v432_v49 = vpop.f32.mrf.mxu3 }
 0x115   :  { %476 = vst.msk [vmem:[#allocation2 + $0xd0] sm:$0xff] %vm240_vm0, %v432_v49  ;;  %v363_v50 = vpop.f32.mrf.mxu0 }
 0x116   :  { %453 = vst.msk [vmem:[#allocation2 + $0x18] sm:$0xff] %vm240_vm0, %v363_v50 }
 0x11b   :  { %v411_v51 = vpop.f32.mrf.mxu2 }
 0x11c   :  { %469 = vst.msk [vmem:[#allocation2 + $0x98] sm:$0xff] %vm240_vm0, %v411_v51  ;;  %v435_v52 = vpop.f32.mrf.mxu3 }
 0x11d   :  { %477 = vst.msk [vmem:[#allocation2 + $0xd8] sm:$0xff] %vm240_vm0, %v435_v52  ;;  %v387_v53 = vpop.f32.mrf.mxu1 }
 0x11e   :  { %461 = vst.msk [vmem:[#allocation2 + $0x58] sm:$0xff] %vm240_vm0, %v387_v53 }
 0x123   :  { %v414_v54 = vpop.f32.mrf.mxu2 }
 0x124   :  { %470 = vst.msk [vmem:[#allocation2 + $0xa0] sm:$0xff] %vm240_vm0, %v414_v54  ;;  %v438_v55 = vpop.f32.mrf.mxu3 }
 0x125   :  { %478 = vst.msk [vmem:[#allocation2 + $0xe0] sm:$0xff] %vm240_vm0, %v438_v55  ;;  %v366_v56 = vpop.f32.mrf.mxu0  ;;  %v390_v57 = vpop.f32.mrf.mxu1 }
 0x126   :  { %454 = vst.msk [vmem:[#allocation2 + $0x20] sm:$0xff] %vm240_vm0, %v366_v56 }
 0x127   :  { %462 = vst.msk [vmem:[#allocation2 + $0x60] sm:$0xff] %vm240_vm0, %v390_v57 }
 0x12c   :  { %v417_v58 = vpop.f32.mrf.mxu2 }
 0x12d   :  { %471 = vst.msk [vmem:[#allocation2 + $0xa8] sm:$0xff] %vm240_vm0, %v417_v58  ;;  %v369_v59 = vpop.f32.mrf.mxu0  ;;  %v393_v60 = vpop.f32.mrf.mxu1 }
 0x12e   :  { %455 = vst.msk [vmem:[#allocation2 + $0x28] sm:$0xff] %vm240_vm0, %v369_v59 }
 0x12f   :  { %463 = vst.msk [vmem:[#allocation2 + $0x68] sm:$0xff] %vm240_vm0, %v393_v60 }
 0x134   :  { %v441_v61 = vpop.f32.mrf.mxu3 }
 0x135   :  { %479 = vst.msk [vmem:[#allocation2 + $0xe8] sm:$0xff] %vm240_vm0, %v441_v61  ;;  %v372_v62 = vpop.f32.mrf.mxu0 }
 0x136   :  { %456 = vst.msk [vmem:[#allocation2 + $0x30] sm:$0xff] %vm240_vm0, %v372_v62 }
 0x13b   :  { %v420_v63 = vpop.f32.mrf.mxu2 }
 0x13c   :  { %472 = vst.msk [vmem:[#allocation2 + $0xb0] sm:$0xff] %vm240_vm0, %v420_v63  ;;  %v444_v0 = vpop.f32.mrf.mxu3 }
 0x13d   :  { %480 = vst.msk [vmem:[#allocation2 + $0xf0] sm:$0xff] %vm240_vm0, %v444_v0  ;;  %v396_v1 = vpop.f32.mrf.mxu1 }
 0x13e   :  { %464 = vst.msk [vmem:[#allocation2 + $0x70] sm:$0xff] %vm240_vm0, %v396_v1 }
 0x143   :  { %v423_v2 = vpop.f32.mrf.mxu2 }
 0x144   :  { %473 = vst.msk [vmem:[#allocation2 + $0xb8] sm:$0xff] %vm240_vm0, %v423_v2  ;;  %v447_v3 = vpop.f32.mrf.mxu3 }
 0x145   :  { %481 = vst.msk [vmem:[#allocation2 + $0xf8] sm:$0xff] %vm240_vm0, %v447_v3  ;;  %v375_v4 = vpop.f32.mrf.mxu0  ;;  %v399_v5 = vpop.f32.mrf.mxu1 }
 0x146   :  { %457 = vst.msk [vmem:[#allocation2 + $0x38] sm:$0xff] %vm240_vm0, %v375_v4 }
 0x147   :  { %465 = vst.msk [vmem:[#allocation2 + $0x78] sm:$0xff] %vm240_vm0, %v399_v5 }
 0x148   :  { %485 = vsyncadd [#allocation3], 3840  ;;  %s488_s21 = sshll.u32 %s861_s2, 4  ;;  %s606_s22 = smov [#allocation2]   ;;  %s489_s21 = int_to_ptr.hbm [resolvable:$true] %s488_s21 }
 0x149   :  { %s486_s23 = sshll.u32 %s606_s22, 4  ;;  %s607_s24 = smov 128   ;;  %s487_s23 = int_to_ptr.vmem [resolvable:$true] %s486_s23 }
 0x14a   :  { %s608_s25 = smov 8  }
 0x14b   :  { %494 = dma.vmem_to_hbm [thread:$0]  %s487_s23, 256, %s489_s21, [#allocation3], %s607_s24, %s607_s24, %s608_s25  }
 0x14c   :  { %602 = dma.done.wait [#allocation3], 4096  }
 0x14d   :  { %603 = vsyncadd [#allocation3], 4294963200 }
 0x14e   :  { %499 = vsyncpa [#allocation3], 1 }

</bundles_post_ra>
